<compile_context>
chip_gen: v5e
topology: v5e:2x2
jax: 0.10.0
libtpu: 0.0.40
codegen_flags: <defaults>
</compile_context>

<pallas_src>
import functools

import jax
import jax.numpy as jnp
from jax import lax
from jax.experimental import pallas as pl
from jax.experimental.pallas import tpu as pltpu

INPUT_SIZE = 10 + 10 + 22 + 9 + 3   # 54
K1_PAD = 64                          # zero-pad input features 54 -> 64 (aligned K)
H1, H2, H3 = 256, 128, 128
OUT = 80
OUT_PAD = 128                        # lane-dense output slab; wrapper slices [:, :80]
BIAS_TOTAL = H1 + H2 + H3 + OUT_PAD  # 640
BN_EPS = 1e-5


def _tetris_kernel(x_ref, w1_ref, w234_ref, bias_ref, o_ref, xpad_ref, *,
                   apply_bn):
    """Whole forward pass for one (small) batch, fully VMEM-resident.

    Matmuls: bf16 inputs + f32 accumulation (native MXU rate).
    Elementwise (bias, BN, ReLU): f32.
    """
    # ---- fold the x pad + bf16 cast into the kernel (single HBM read of x) --
    xpad_ref[...] = jnp.zeros_like(xpad_ref)
    xpad_ref[:, :INPUT_SIZE] = x_ref[...].astype(jnp.bfloat16)
    xp = xpad_ref[...]                                   # (B, 64) bf16

    # ---- static, lane/sublane-aligned slices of the packed parameter slabs --
    b1 = bias_ref[:, 0:H1]                               # (1, 256) f32
    b2 = bias_ref[:, H1:H1 + H2]                         # (1, 128) f32
    b3 = bias_ref[:, H1 + H2:H1 + H2 + H3]               # (1, 128) f32
    b4 = bias_ref[:, H1 + H2 + H3:BIAS_TOTAL]            # (1, 128) f32
    w2 = w234_ref[0:H1, :]                               # (256, 128) bf16
    w3 = w234_ref[H1:H1 + H2, :]                         # (128, 128) bf16
    w4 = w234_ref[H1 + H2:H1 + H2 + H3, :]               # (128, 128) bf16

    def batchnorm(h):
        # training-mode BatchNorm1d, gamma=1, beta=0.  Independent sum /
        # sum-of-squares reductions (shorter dependence chain than the
        # hoisted-centering form); clamp guards against tiny cancellation.
        mean = jnp.mean(h, axis=0, keepdims=True)
        msq = jnp.mean(h * h, axis=0, keepdims=True)
        var = jnp.maximum(msq - mean * mean, 0.0)        # biased batch variance
        return (h - mean) * lax.rsqrt(var + BN_EPS)

    def block(h_bf16, w, b, bn, relu):
        h = jnp.dot(h_bf16, w, preferred_element_type=jnp.float32) + b
        if bn:
            h = batchnorm(h)
        if relu:
            h = jnp.maximum(h, 0.0)
        return h

    h = block(xp, w1_ref[...], b1, bn=apply_bn, relu=True)
    h = block(h.astype(jnp.bfloat16), w2, b2, bn=apply_bn, relu=True)
    h = block(h.astype(jnp.bfloat16), w3, b3, bn=apply_bn, relu=True)
    h = block(h.astype(jnp.bfloat16), w4, b4, bn=False, relu=False)
    o_ref[...] = h.astype(o_ref.dtype)   # unmasked lane-dense (B, 128) store


def _full_spec(shape):
    zeros = (0,) * len(shape)
    return pl.BlockSpec(shape, lambda: zeros)


def tetris_net_forward(x, kparams):
    """x: (B, 54) float32.  kparams: packed params from prepare_params()."""
    B = x.shape[0]
    apply_bn = B > 1   # static, mirrors `if x.size(0) > 1` in the PyTorch forward

    args = (x, kparams["w1"], kparams["w234"], kparams["bias"])
    kernel = functools.partial(_tetris_kernel, apply_bn=apply_bn)

    out_padded = pl.pallas_call(
        kernel,
        out_shape=jax.ShapeDtypeStruct((B, OUT_PAD), jnp.float32),
        grid=(),
        in_specs=[_full_spec(a.shape) for a in args],
        out_specs=_full_spec((B, OUT_PAD)),
        scratch_shapes=[pltpu.VMEM((B, K1_PAD), jnp.bfloat16)],
    )(*args)
    # Padded lane-dense output; slice to the logical 80 columns for the caller.
    return out_padded[:, :OUT]


# ---------------------------------------------------------------------------
# Parameters (stored as (in, out) = PyTorch weight.T; biases as (1, out) rows)
# ---------------------------------------------------------------------------

def _xavier_uniform(key, fan_in, fan_out):
    # matches nn.init.xavier_uniform_ (gain=1)
    limit = jnp.sqrt(6.0 / (fan_in + fan_out))
    return jax.random.uniform(key, (fan_in, fan_out), jnp.float32, -limit, limit)


def _linear_bias(key, fan_in, fan_out):
    # PyTorch nn.Linear default bias init: U(-1/sqrt(fan_in), 1/sqrt(fan_in))
    bound = 1.0 / jnp.sqrt(jnp.float32(fan_in))
    return jax.random.uniform(key, (1, fan_out), jnp.float32, -bound, bound)


def init_params(key):
    """Logical (unpadded, f32) parameters — PyTorch-equivalent values."""
    ks = jax.random.split(key, 8)
    dims = [(INPUT_SIZE, H1), (H1, H2), (H2, H3), (H3, OUT)]
    params = {}
    for i, (fi, fo) in enumerate(dims, start=1):
        params[f"w{i}"] = _xavier_uniform(ks[2 * (i - 1)], fi, fo)
        params[f"b{i}"] = _linear_bias(ks[2 * (i - 1) + 1], fi, fo)
    return params


def prepare_params(params):
    """Pack parameters into 4 DMA slabs: w1 (bf16), w2|w3|w4 (bf16), biases (f32)."""
    p = {}
    # fc1: zero-pad K 54 -> 64 (matches the in-kernel zero-padded x columns).
    p["w1"] = jnp.pad(params["w1"],
                      ((0, K1_PAD - INPUT_SIZE), (0, 0))).astype(jnp.bfloat16)
    # fc2/fc3/fc4 (all 128 output lanes) packed row-wise into one bf16 slab;
    # fc4 zero-padded 80 -> 128 for a lane-dense output store.
    w4p = jnp.pad(params["w4"], ((0, 0), (0, OUT_PAD - OUT)))
    p["w234"] = jnp.concatenate([params["w2"], params["w3"], w4p],
                                axis=0).astype(jnp.bfloat16)      # (512, 128)
    # All biases packed into one f32 row: [b1(256) | b2(128) | b3(128) | b4(128)].
    b4p = jnp.pad(params["b4"], ((0, 0), (0, OUT_PAD - OUT)))
    p["bias"] = jnp.concatenate([params["b1"], params["b2"], params["b3"], b4p],
                                axis=1)                           # (1, 640)
    return p


# ---------------------------------------------------------------------------
# Pure-JAX f32 reference (PyTorch semantics) for the self-check
# ---------------------------------------------------------------------------

def _reference(x, params):
    def bn(h):
        m = jnp.mean(h, axis=0, keepdims=True)
        v = jnp.mean((h - m) ** 2, axis=0, keepdims=True)
        return (h - m) / jnp.sqrt(v + BN_EPS)

    apply_bn = x.shape[0] > 1
    h = x
    for i, last in zip(range(1, 5), (False, False, False, True)):
        h = h @ params[f"w{i}"] + params[f"b{i}"]
        if not last:
            if apply_bn:
                h = bn(h)
            h = jnp.maximum(h, 0.0)
    return h


if __name__ == "__main__":
    key = jax.random.PRNGKey(0)
    pkey, xkey = jax.random.split(key)
    params = init_params(pkey)
    kparams = prepare_params(params)

    B = 8  # batch > 1 so the BatchNorm branch is exercised
    x = jax.random.normal(xkey, (B, INPUT_SIZE), jnp.float32)

    out = tetris_net_forward(x, kparams)
    out = jax.block_until_ready(out)

    ref = _reference(x, params)
    assert out.shape == (B, OUT)
    # tolerance loosened vs the f32 reference because matmul inputs are bf16
    assert jnp.allclose(out, ref, atol=5e-2, rtol=5e-2), "mismatch vs reference"

    print("KERNEL_OK")
</pallas_src>

<mosaic_0001>
module attributes {stable_mosaic.version = 11 : i64} {
  func.func @_tetris_kernel(%arg0: memref<8x54xf32, #tpu.memory_space<vmem>>, %arg1: memref<64x256xbf16, #tpu.memory_space<vmem>>, %arg2: memref<512x128xbf16, #tpu.memory_space<vmem>>, %arg3: memref<1x640xf32, #tpu.memory_space<vmem>>, %arg4: memref<8x128xf32, #tpu.memory_space<vmem>>, %arg5: memref<8x64xbf16, #tpu.memory_space<vmem>>) attributes {dimension_semantics = [], scalar_prefetch = 0 : i64, scratch_operands = 1 : i64, tpu.core_type = #tpu.core_type<tc>} {
    %cst = arith.constant 0.000000e+00 : bf16
    %0 = vector.broadcast %cst : bf16 to vector<8x64xbf16>
    %c0 = arith.constant 0 : index
    %c0_0 = arith.constant 0 : index
    %1 = vector.load %arg5[%c0, %c0_0] : memref<8x64xbf16, #tpu.memory_space<vmem>>, vector<8x64xbf16>
    tpu.vector_store %arg5[%c0, %c0_0], %0 {strides = array<i32>} : memref<8x64xbf16, #tpu.memory_space<vmem>>, vector<8x64xbf16>,
    %c0_1 = arith.constant 0 : index
    %c0_2 = arith.constant 0 : index
    %2 = vector.load %arg0[%c0_1, %c0_2] : memref<8x54xf32, #tpu.memory_space<vmem>>, vector<8x54xf32>
    %3 = arith.truncf %2 : vector<8x54xf32> to vector<8x54xbf16>
    %c0_3 = arith.constant 0 : index
    %c0_4 = arith.constant 0 : index
    %4 = vector.load %arg5[%c0_3, %c0_4] : memref<8x64xbf16, #tpu.memory_space<vmem>>, vector<8x54xbf16>
    tpu.vector_store %arg5[%c0_3, %c0_4], %3 {strides = array<i32>} : memref<8x64xbf16, #tpu.memory_space<vmem>>, vector<8x54xbf16>,
    %c0_5 = arith.constant 0 : index
    %c0_6 = arith.constant 0 : index
    %5 = vector.load %arg5[%c0_5, %c0_6] : memref<8x64xbf16, #tpu.memory_space<vmem>>, vector<8x64xbf16>
    %c0_7 = arith.constant 0 : index
    %c0_8 = arith.constant 0 : index
    %6 = vector.load %arg3[%c0_7, %c0_8] : memref<1x640xf32, #tpu.memory_space<vmem>>, vector<1x256xf32>
    %c0_9 = arith.constant 0 : index
    %c256 = arith.constant 256 : index
    %7 = vector.load %arg3[%c0_9, %c256] : memref<1x640xf32, #tpu.memory_space<vmem>>, vector<1x128xf32>
    %c0_10 = arith.constant 0 : index
    %c384 = arith.constant 384 : index
    %8 = vector.load %arg3[%c0_10, %c384] : memref<1x640xf32, #tpu.memory_space<vmem>>, vector<1x128xf32>
    %c0_11 = arith.constant 0 : index
    %c512 = arith.constant 512 : index
    %9 = vector.load %arg3[%c0_11, %c512] : memref<1x640xf32, #tpu.memory_space<vmem>>, vector<1x128xf32>
    %c0_12 = arith.constant 0 : index
    %c0_13 = arith.constant 0 : index
    %10 = vector.load %arg2[%c0_12, %c0_13] : memref<512x128xbf16, #tpu.memory_space<vmem>>, vector<256x128xbf16>
    %c256_14 = arith.constant 256 : index
    %c0_15 = arith.constant 0 : index
    %11 = vector.load %arg2[%c256_14, %c0_15] : memref<512x128xbf16, #tpu.memory_space<vmem>>, vector<128x128xbf16>
    %c384_16 = arith.constant 384 : index
    %c0_17 = arith.constant 0 : index
    %12 = vector.load %arg2[%c384_16, %c0_17] : memref<512x128xbf16, #tpu.memory_space<vmem>>, vector<128x128xbf16>
    %c0_18 = arith.constant 0 : index
    %c0_19 = arith.constant 0 : index
    %13 = vector.load %arg1[%c0_18, %c0_19] : memref<64x256xbf16, #tpu.memory_space<vmem>>, vector<64x256xbf16>
    %cst_20 = arith.constant dense<0.000000e+00> : vector<8x256xf32>
    %14 = tpu.matmul %5, %13, %cst_20 {dimension_numbers = #tpu.dot_dimension_numbers<[1], [0], [0], [1], [0, 0, 1, 1], [], []>} : vector<8x64xbf16>, vector<64x256xbf16>, vector<8x256xf32> -> vector<8x256xf32>
    %15 = vector.broadcast %6 : vector<1x256xf32> to vector<8x256xf32>
    %16 = arith.addf %14, %15 : vector<8x256xf32>
    %cst_21 = arith.constant dense<0.000000e+00> : vector<256xf32>
    %17 = vector.multi_reduction <add>, %16, %cst_21 [0] : vector<8x256xf32> to vector<256xf32>
    %18 = vector.shape_cast %17 : vector<256xf32> to vector<1x256xf32>
    %cst_22 = arith.constant 8.000000e+00 : f32
    %19 = vector.broadcast %cst_22 : f32 to vector<1x256xf32>
    %20 = arith.divf %18, %19 : vector<1x256xf32>
    %21 = arith.mulf %16, %16 : vector<8x256xf32>
    %cst_23 = arith.constant dense<0.000000e+00> : vector<256xf32>
    %22 = vector.multi_reduction <add>, %21, %cst_23 [0] : vector<8x256xf32> to vector<256xf32>
    %23 = vector.shape_cast %22 : vector<256xf32> to vector<1x256xf32>
    %cst_24 = arith.constant 8.000000e+00 : f32
    %24 = vector.broadcast %cst_24 : f32 to vector<1x256xf32>
    %25 = arith.divf %23, %24 : vector<1x256xf32>
    %26 = arith.mulf %20, %20 : vector<1x256xf32>
    %27 = arith.subf %25, %26 : vector<1x256xf32>
    %cst_25 = arith.constant 0.000000e+00 : f32
    %28 = vector.broadcast %cst_25 : f32 to vector<1x256xf32>
    %29 = arith.maximumf %27, %28 : vector<1x256xf32>
    %30 = vector.broadcast %20 : vector<1x256xf32> to vector<8x256xf32>
    %31 = arith.subf %16, %30 : vector<8x256xf32>
    %cst_26 = arith.constant 9.99999974E-6 : f32
    %32 = vector.broadcast %cst_26 : f32 to vector<1x256xf32>
    %33 = arith.addf %29, %32 : vector<1x256xf32>
    %34 = math.rsqrt %33 : vector<1x256xf32>
    %35 = vector.broadcast %34 : vector<1x256xf32> to vector<8x256xf32>
    %36 = arith.mulf %31, %35 : vector<8x256xf32>
    %cst_27 = arith.constant 0.000000e+00 : f32
    %37 = vector.broadcast %cst_27 : f32 to vector<8x256xf32>
    %38 = arith.maximumf %36, %37 : vector<8x256xf32>
    %39 = arith.truncf %38 : vector<8x256xf32> to vector<8x256xbf16>
    %cst_28 = arith.constant dense<0.000000e+00> : vector<8x128xf32>
    %40 = tpu.matmul %39, %10, %cst_28 {dimension_numbers = #tpu.dot_dimension_numbers<[1], [0], [0], [1], [0, 0, 1, 1], [], []>} : vector<8x256xbf16>, vector<256x128xbf16>, vector<8x128xf32> -> vector<8x128xf32>
    %41 = vector.broadcast %7 : vector<1x128xf32> to vector<8x128xf32>
    %42 = arith.addf %40, %41 : vector<8x128xf32>
    %cst_29 = arith.constant dense<0.000000e+00> : vector<128xf32>
    %43 = vector.multi_reduction <add>, %42, %cst_29 [0] : vector<8x128xf32> to vector<128xf32>
    %44 = vector.shape_cast %43 : vector<128xf32> to vector<1x128xf32>
    %cst_30 = arith.constant 8.000000e+00 : f32
    %45 = vector.broadcast %cst_30 : f32 to vector<1x128xf32>
    %46 = arith.divf %44, %45 : vector<1x128xf32>
    %47 = arith.mulf %42, %42 : vector<8x128xf32>
    %cst_31 = arith.constant dense<0.000000e+00> : vector<128xf32>
    %48 = vector.multi_reduction <add>, %47, %cst_31 [0] : vector<8x128xf32> to vector<128xf32>
    %49 = vector.shape_cast %48 : vector<128xf32> to vector<1x128xf32>
    %cst_32 = arith.constant 8.000000e+00 : f32
    %50 = vector.broadcast %cst_32 : f32 to vector<1x128xf32>
    %51 = arith.divf %49, %50 : vector<1x128xf32>
    %52 = arith.mulf %46, %46 : vector<1x128xf32>
    %53 = arith.subf %51, %52 : vector<1x128xf32>
    %cst_33 = arith.constant 0.000000e+00 : f32
    %54 = vector.broadcast %cst_33 : f32 to vector<1x128xf32>
    %55 = arith.maximumf %53, %54 : vector<1x128xf32>
    %56 = vector.broadcast %46 : vector<1x128xf32> to vector<8x128xf32>
    %57 = arith.subf %42, %56 : vector<8x128xf32>
    %cst_34 = arith.constant 9.99999974E-6 : f32
    %58 = vector.broadcast %cst_34 : f32 to vector<1x128xf32>
    %59 = arith.addf %55, %58 : vector<1x128xf32>
    %60 = math.rsqrt %59 : vector<1x128xf32>
    %61 = vector.broadcast %60 : vector<1x128xf32> to vector<8x128xf32>
    %62 = arith.mulf %57, %61 : vector<8x128xf32>
    %cst_35 = arith.constant 0.000000e+00 : f32
    %63 = vector.broadcast %cst_35 : f32 to vector<8x128xf32>
    %64 = arith.maximumf %62, %63 : vector<8x128xf32>
    %65 = arith.truncf %64 : vector<8x128xf32> to vector<8x128xbf16>
    %cst_36 = arith.constant dense<0.000000e+00> : vector<8x128xf32>
    %66 = tpu.matmul %65, %11, %cst_36 {dimension_numbers = #tpu.dot_dimension_numbers<[1], [0], [0], [1], [0, 0, 1, 1], [], []>} : vector<8x128xbf16>, vector<128x128xbf16>, vector<8x128xf32> -> vector<8x128xf32>
    %67 = vector.broadcast %8 : vector<1x128xf32> to vector<8x128xf32>
    %68 = arith.addf %66, %67 : vector<8x128xf32>
    %cst_37 = arith.constant dense<0.000000e+00> : vector<128xf32>
    %69 = vector.multi_reduction <add>, %68, %cst_37 [0] : vector<8x128xf32> to vector<128xf32>
    %70 = vector.shape_cast %69 : vector<128xf32> to vector<1x128xf32>
    %cst_38 = arith.constant 8.000000e+00 : f32
    %71 = vector.broadcast %cst_38 : f32 to vector<1x128xf32>
    %72 = arith.divf %70, %71 : vector<1x128xf32>
    %73 = arith.mulf %68, %68 : vector<8x128xf32>
    %cst_39 = arith.constant dense<0.000000e+00> : vector<128xf32>
    %74 = vector.multi_reduction <add>, %73, %cst_39 [0] : vector<8x128xf32> to vector<128xf32>
    %75 = vector.shape_cast %74 : vector<128xf32> to vector<1x128xf32>
    %cst_40 = arith.constant 8.000000e+00 : f32
    %76 = vector.broadcast %cst_40 : f32 to vector<1x128xf32>
    %77 = arith.divf %75, %76 : vector<1x128xf32>
    %78 = arith.mulf %72, %72 : vector<1x128xf32>
    %79 = arith.subf %77, %78 : vector<1x128xf32>
    %cst_41 = arith.constant 0.000000e+00 : f32
    %80 = vector.broadcast %cst_41 : f32 to vector<1x128xf32>
    %81 = arith.maximumf %79, %80 : vector<1x128xf32>
    %82 = vector.broadcast %72 : vector<1x128xf32> to vector<8x128xf32>
    %83 = arith.subf %68, %82 : vector<8x128xf32>
    %cst_42 = arith.constant 9.99999974E-6 : f32
    %84 = vector.broadcast %cst_42 : f32 to vector<1x128xf32>
    %85 = arith.addf %81, %84 : vector<1x128xf32>
    %86 = math.rsqrt %85 : vector<1x128xf32>
    %87 = vector.broadcast %86 : vector<1x128xf32> to vector<8x128xf32>
    %88 = arith.mulf %83, %87 : vector<8x128xf32>
    %cst_43 = arith.constant 0.000000e+00 : f32
    %89 = vector.broadcast %cst_43 : f32 to vector<8x128xf32>
    %90 = arith.maximumf %88, %89 : vector<8x128xf32>
    %91 = arith.truncf %90 : vector<8x128xf32> to vector<8x128xbf16>
    %cst_44 = arith.constant dense<0.000000e+00> : vector<8x128xf32>
    %92 = tpu.matmul %91, %12, %cst_44 {dimension_numbers = #tpu.dot_dimension_numbers<[1], [0], [0], [1], [0, 0, 1, 1], [], []>} : vector<8x128xbf16>, vector<128x128xbf16>, vector<8x128xf32> -> vector<8x128xf32>
    %93 = vector.broadcast %9 : vector<1x128xf32> to vector<8x128xf32>
    %94 = arith.addf %92, %93 : vector<8x128xf32>
    %c0_45 = arith.constant 0 : index
    %c0_46 = arith.constant 0 : index
    %95 = vector.load %arg4[%c0_45, %c0_46] : memref<8x128xf32, #tpu.memory_space<vmem>>, vector<8x128xf32>
    tpu.vector_store %arg4[%c0_45, %c0_46], %94 {strides = array<i32>} : memref<8x128xf32, #tpu.memory_space<vmem>>, vector<8x128xf32>,
    return
  }
}

</mosaic_0001>

<bundles_post_ra>
// kernel: tpu_custom_call.1
= control target key start
LH: loop header
LB: loop body
LE: loop exit
PB: predicated region body
PF: predicated region fallthrough
CT: control target
= control target key end

     0   :  { %9 = vsyncpa [#allocation4], 0  ;;  %s1077_s0 = inlined_call_operand.hbm [shape: f32[8,54], index: 0, kind: input, shape index: {}]   ;;  %s1078_s1 = inlined_call_operand.hbm [shape: bf16[64,256], index: 1, kind: input, shape index: {}]   ;;  %s1079_s2 = inlined_call_operand.hbm [shape: bf16[512,128], index: 2, kind: input, shape index: {}]   ;;  %s1080_s3 = inlined_call_operand.hbm [shape: f32[1,640], index: 3, kind: input, shape index: {}]   ;;  %s1081_s4 = inlined_call_operand.hbm [shape: f32[8,128], index: 4, kind: output, shape index: {}]  }
   0x1   :  { %10 = vsyncpa [#allocation7], 0 }
   0x2   :  { %11 = vsyncpa [#allocation10], 0  ;;  %s28_s17 = sshll.u32 %s1078_s1, 4  ;;  %s29_s17 = int_to_ptr.hbm [resolvable:$true] %s28_s17 }
   0x3   :  { %12 = vsyncpa [#allocation5], 0  ;;  %s1002_s18 = smov [#allocation6]   ;;  %s18_s22 = sshll.u32 %s1077_s0, 4  ;;  %s19_s22 = int_to_ptr.hbm [resolvable:$true] %s18_s22 }
   0x4   :  { %s30_s19 = sshll.u32 %s1002_s18, 4  ;;  %s1003_s23 = smov 128   ;;  %s31_s19 = int_to_ptr.vmem [resolvable:$true] %s30_s19 }
   0x5   :  { %s1004_s24 = smov 8   ;;  %s1005_s25 = smov [#allocation3]  }
   0x6   :  { %36 = dma.hbm_to_vmem [thread:$0]  %s29_s17, 1024, %s31_s19, [#allocation7], %s1003_s23, %s1003_s23, %s1004_s24  }
   0x7   :  { %s20_s26 = sshll.u32 %s1005_s25, 4  ;;  %s41_s29 = sshll.u32 %s1079_s2, 4  ;;  %s21_s26 = int_to_ptr.vmem [resolvable:$true] %s20_s26  ;;  %s42_s29 = int_to_ptr.hbm [resolvable:$true] %s41_s29 }
   0x8   :  { %23 = dma.hbm_to_vmem [thread:$0]  %s19_s22, 128, %s21_s26, [#allocation4]  }
   0x9   :  { %s1006_s1 = smov [#allocation8]   ;;  %s55_s0 = sshll.u32 %s1080_s3, 4  ;;  %s56_s0 = int_to_ptr.hbm [resolvable:$true] %s55_s0 }
   0xa   :  { %s43_s30 = sshll.u32 %s1006_s1, 4  ;;  %s1007_s7 = smov 64   ;;  %s44_s30 = int_to_ptr.vmem [resolvable:$true] %s43_s30 }
   0xb   :  { %s1008_s8 = smov 4   ;;  %s1009_s9 = smov [#allocation9]  }
   0xc   :  { %49 = dma.hbm_to_vmem [thread:$0]  %s42_s29, 4096, %s44_s30, [#allocation7], %s1007_s7, %s1007_s7, %s1008_s8  }
   0xd   :  { %s57_s10 = sshll.u32 %s1009_s9, 4  ;;  %s58_s10 = int_to_ptr.vmem [resolvable:$true] %s57_s10 }
   0xe   :  { %60 = dma.hbm_to_vmem [thread:$0]  %s56_s0, 80, %s58_s10, [#allocation10]  }
   0xf   :  { %994 = dma.done.wait [#allocation4], 128  }
  0x10   :  { %995 = vsyncadd [#allocation4], 4294967168 }
  0x11   :  { %996 = dma.done.wait [#allocation7], 5120  }
  0x12   :  { %997 = vsyncadd [#allocation7], 4294962176 }
  0x13   :  { %998 = dma.done.wait [#allocation10], 80  }
  0x14   :  { %999 = vsyncadd [#allocation10], 4294967216  ;;  %vm78_vm0 = vcmask 519168   ;;  %v1010_v0 = vmov 0   ;;  %v674_v1 = vld [vmem:[#allocation6 + $0x30] sm:$0xf] }
  0x15   :  { %79 = vst.msk [vmem:[#allocation2] sm:$0xf] %vm78_vm0, %v1010_v0  ;;  %v849_v2 = vld [vmem:[#allocation6 + $0x34] sm:$0xf0]  ;;  %v848_v3 = vld [vmem:[#allocation6 + $0x34] sm:$0xf] }
  0x16   :  { %v675_v4 = vor.u32 %v849_v2, %v674_v1  ;;  %v676_v5 = vld [vmem:[#allocation6 + $0x38] sm:$0xf0]  ;;  %v666_v6 = vld [vmem:[#allocation6 + $0x20] sm:$0xf]  ;;  %v847_v7 = vld [vmem:[#allocation6 + $0x24] sm:$0xf0] }
  0x17   :  { %v679_v8 = vor.u32 %v848_v3, %v676_v5  ;;  %v846_v9 = vld [vmem:[#allocation6 + $0x24] sm:$0xf]  ;;  %v668_v10 = vld [vmem:[#allocation6 + $0x28] sm:$0xf0]  ;;  %v667_v11 = vor.u32 %v847_v7, %v666_v6  ;;  %v658_v13 = vld [vmem:[#allocation6 + $0x10] sm:$0xf] }
  0x18   :  { %214 = vmatpush.bf16.msra.mxu0 %v675_v4  ;;  %v671_v12 = vor.u32 %v846_v9, %v668_v10  ;;  %v845_v14 = vld [vmem:[#allocation6 + $0x14] sm:$0xf0]  ;;  %v844_v15 = vld [vmem:[#allocation6 + $0x14] sm:$0xf]  ;;  %v660_v16 = vld [vmem:[#allocation6 + $0x18] sm:$0xf0] }
  0x19   :  { %227 = vmatpush.bf16.msra.mxu1 %v679_v8  ;;  %v80_v17 = vld [vmem:[#allocation3] sm:$0xff]  ;;  %vm82_vm1 = vcmask 437248   ;;  %v659_v19 = vor.u32 %v845_v14, %v658_v13  ;;  %v663_v20 = vor.u32 %v844_v15, %v660_v16  ;;  %v650_v21 = vld [vmem:[#allocation6] sm:$0xf]  ;;  %v843_v22 = vld [vmem:[#allocation6 + $0x4] sm:$0xf0] }
  0x1a   :  { %v81_v18 = vpack.c.bf16 %v80_v17, %v80_v17  ;;  %v842_v23 = vld [vmem:[#allocation6 + $0x4] sm:$0xf]  ;;  %v652_v24 = vld [vmem:[#allocation6 + $0x8] sm:$0xf0]  ;;  %v651_v25 = vor.u32 %v843_v22, %v650_v21  ;;  %vm206_vm2 = vcmask 523264   ;;  %v817_v28 = vld [vmem:[#allocation8 + $0x38] sm:$0xff] }
  0x1b   :  { %v655_v26 = vor.u32 %v842_v23, %v652_v24  ;;  %v825_v29 = vld [vmem:[#allocation8 + $0x78] sm:$0xff]  ;;  %408 = vmatpush.bf16.msra.mxu2 %v817_v28  ;;  %v816_v30 = vld [vmem:[#allocation8 + $0x30] sm:$0xff]  ;;  %v1011_v32 = vmov 8.0   ;;  %v815_v33 = vld [vmem:[#allocation8 + $0x28] sm:$0xff]  ;;  %s1012_s2 = smov [#allocation11]   ;;  %s636_s13 = sshll.u32 %s1081_s4, 4  ;;  %s637_s13 = int_to_ptr.hbm [resolvable:$true] %s636_s13 }
  0x1c   :  { %215 = vmatpush.bf16.msra.mxu0 %v667_v11  ;;  %83 = vst.msk [vmem:[#allocation2] sm:$0xf] %vm82_vm1, %v81_v18  ;;  %421 = vmatpush.bf16.msra.mxu3 %v825_v29  ;;  %v824_v31 = vld [vmem:[#allocation8 + $0x70] sm:$0xff]  ;;  %864 = vrcp.f32 %v1011_v32  ;;  %v823_v34 = vld [vmem:[#allocation8 + $0x68] sm:$0xff]  ;;  %v814_v35 = vld [vmem:[#allocation8 + $0x20] sm:$0xff]  ;;  %s634_s3 = sshll.u32 %s1012_s2, 4  ;;  %s635_s3 = int_to_ptr.vmem [resolvable:$true] %s634_s3 }
  0x1d   :  { %228 = vmatpush.bf16.msra.mxu1 %v671_v12  ;;  %v822_v36 = vld [vmem:[#allocation8 + $0x60] sm:$0xff]  ;;  %v813_v39 = vld [vmem:[#allocation8 + $0x18] sm:$0xff]  ;;  %v812_v45 = vld [vmem:[#allocation8 + $0x10] sm:$0xff] }
  0x1e   :  { %v85_v38 = vld [vmem:[#allocation9] sm:$0x3]  ;;  %v821_v40 = vld [vmem:[#allocation8 + $0x58] sm:$0xff]  ;;  %v820_v46 = vld [vmem:[#allocation8 + $0x50] sm:$0xff] }
  0x1f   :  { %409 = vmatpush.bf16.msra.mxu2 %v816_v30  ;;  %v162_v42 = vperm.slane %v85_v38, 0  ;;  %v163_v43 = vperm.slane %v85_v38, 1  ;;  %v811_v55 = vld [vmem:[#allocation8 + $0x8] sm:$0xff]  ;;  %v810_v3 = vld [vmem:[#allocation8] sm:$0xff] }
  0x20   :  { %216 = vmatpush.bf16.msra.mxu0 %v659_v19  ;;  %422 = vmatpush.bf16.msra.mxu3 %v824_v31  ;;  %v819_v56 = vld [vmem:[#allocation8 + $0x48] sm:$0xff]  ;;  %v818_v4 = vld [vmem:[#allocation8 + $0x40] sm:$0xff] }
  0x21   :  { %229 = vmatpush.bf16.msra.mxu1 %v663_v20 }
  0x22   :  { %v865_v37 = vpop.eup %864 }
  0x23   :  { %v84_v27 = vld [vmem:[#allocation2] sm:$0xf]  ;;  %410 = vmatpush.bf16.msra.mxu2 %v815_v33  ;;  %v249_v41 = vmul.f32 8.0, %v865_v37  ;;  %vm253_vm3 = vweird.f32 %v865_v37 }
  0x24   :  { %217 = vmatpush.bf16.msra.mxu0 %v651_v25  ;;  %423 = vmatpush.bf16.msra.mxu3 %v823_v34 }
  0x25   :  { %230 = vmatpush.bf16.msra.mxu1 %v655_v26  ;;  %v250_v47 = vsub.f32 1.0, %v249_v41 }
  0x27   :  { %680 = vmatmul.msk.bf16.vlgmr.msra.gmra.mxu0 %vm206_vm2, %v84_v27  ;;  %411 = vmatpush.bf16.msra.mxu2 %v814_v35  ;;  %v251_v57 = vmul.f32 %v865_v37, %v250_v47 }
  0x28   :  { %681 = vmatmul.msk.bf16.vlgmr.msra.gmra.mxu1 %vm206_vm2, %v84_v27  ;;  %424 = vmatpush.bf16.msra.mxu3 %v822_v36 }
  0x29   :  { %v252_v5 = vadd.f32 %v865_v37, %v251_v57 }
  0x2b   :  { %412 = vmatpush.bf16.msra.mxu2 %v813_v39  ;;  %v1062_v14 = vsel %vm253_vm3, %v865_v37, %v252_v5 }
  0x2c   :  { %425 = vmatpush.bf16.msra.mxu3 %v821_v40 }
  0x2f   :  { %413 = vmatpush.bf16.msra.mxu2 %v812_v45 }
  0x30   :  { %426 = vmatpush.bf16.msra.mxu3 %v820_v46 }
  0x33   :  { %414 = vmatpush.bf16.msra.mxu2 %v811_v55 }
  0x34   :  { %427 = vmatpush.bf16.msra.mxu3 %v819_v56 }
  0x37   :  { %415 = vmatpush.bf16.msra.mxu2 %v810_v3 }
  0x38   :  { %428 = vmatpush.bf16.msra.mxu3 %v818_v4 }
  0xa4   :  { %v219_v44 = vpop.f32.mrf.mxu0 }
  0xa5   :  { %v1050_v48 = vadd.f32 %v219_v44, %v162_v42  ;;  %v232_v49 = vpop.f32.mrf.mxu1 }
  0xa6   :  { %v1052_v50 = vadd.f32 %v232_v49, %v163_v43 }
  0xa7   :  { %v236_v51 = vrot.slane %v1050_v48, 4  ;;  %v257_v52 = vmul.f32 %v1050_v48, %v1050_v48 }
  0xa8   :  { %v242_v53 = vrot.slane %v1052_v50, 4  ;;  %v258_v54 = vmul.f32 %v1052_v50, %v1052_v50 }
  0xa9   :  { %v237_v58 = vadd.f32 %v236_v51, %v1050_v48  ;;  %v259_v59 = vrot.slane %v257_v52, 4 }
  0xaa   :  { %v243_v60 = vadd.f32 %v242_v53, %v1052_v50  ;;  %v265_v61 = vrot.slane %v258_v54, 4 }
  0xab   :  { %v238_v62 = vrot.slane %v237_v58, 2  ;;  %v260_v63 = vadd.f32 %v259_v59, %v257_v52  ;;  %v832_v59 = vld [vmem:[#allocation8 + $0xb0] sm:$0xff] }
  0xac   :  { %v244_v0 = vrot.slane %v243_v60, 2  ;;  %v266_v1 = vadd.f32 %v265_v61, %v258_v54  ;;  %v221_v2 = vpop.f32.mrf.mxu0  ;;  %v861_v61 = vld [vmem:[#allocation9 + $0x2] ss:$0 sm:$0xff] }
  0xad   :  { %v261_v6 = vrot.slane %v260_v63, 2  ;;  %v234_v7 = vpop.f32.mrf.mxu1  ;;  %v239_v8 = vadd.f32 %v238_v62, %v237_v58  ;;  %v833_v58 = vld [vmem:[#allocation8 + $0xb8] sm:$0xff]  ;;  %v828_v2 = vld [vmem:[#allocation8 + $0x90] sm:$0xff] }
  0xae   :  { %v267_v9 = vrot.slane %v266_v1, 2  ;;  %v245_v10 = vadd.f32 %v244_v0, %v243_v60  ;;  %518 = vmatpush.bf16.msrb.mxu0 %v833_v58  ;;  %v830_v60 = vld [vmem:[#allocation8 + $0xa0] sm:$0xff]  ;;  %v827_v7 = vld [vmem:[#allocation8 + $0x88] sm:$0xff] }
  0xaf   :  { %v262_v11 = vadd.f32 %v261_v6, %v260_v63  ;;  %v240_v12 = vrot.slane %v239_v8, 1 }
  0xb0   :  { %v268_v13 = vadd.f32 %v267_v9, %v266_v1  ;;  %v246_v15 = vrot.slane %v245_v10, 1 }
  0xb1   :  { %v263_v16 = vrot.slane %v262_v11, 1  ;;  %v241_v17 = vadd.f32 %v240_v12, %v239_v8 }
  0xb2   :  { %v269_v18 = vrot.slane %v268_v13, 1  ;;  %v247_v19 = vadd.f32 %v246_v15, %v245_v10  ;;  %519 = vmatpush.bf16.msrb.mxu0 %v832_v59  ;;  %v826_v15 = vld [vmem:[#allocation8 + $0x80] sm:$0xff] }
  0xb3   :  { %v255_v20 = vmul.f32 %v1062_v14, %v241_v17  ;;  %v264_v21 = vadd.f32 %v263_v16, %v262_v11  ;;  %v834_v59 = vld [vmem:[#allocation8 + $0xc0] sm:$0xff] }
  0xb4   :  { %v256_v22 = vmul.f32 %v1062_v14, %v247_v19  ;;  %v270_v23 = vadd.f32 %v269_v18, %v268_v13 }
  0xb5   :  { %v271_v24 = vmul.f32 %v264_v21, %v1062_v14  ;;  %v273_v25 = vmul.f32 %v255_v20, %v255_v20  ;;  %v279_v45 = vsub.f32 %v1050_v48, %v255_v20  ;;  %v831_v48 = vld [vmem:[#allocation8 + $0xa8] sm:$0xff] }
  0xb6   :  { %v272_v26 = vmul.f32 %v270_v23, %v1062_v14  ;;  %v274_v27 = vmul.f32 %v256_v22, %v256_v22  ;;  %v280_v49 = vsub.f32 %v1052_v50, %v256_v22  ;;  %520 = vmatpush.bf16.msrb.mxu0 %v831_v48  ;;  %v829_v50 = vld [vmem:[#allocation8 + $0x98] sm:$0xff] }
  0xb7   :  { %v275_v28 = vsub.f32 %v271_v24, %v273_v25 }
  0xb8   :  { %v276_v29 = vsub.f32 %v272_v26, %v274_v27 }
  0xb9   :  { %v277_v30 = vmax.f32 %v275_v28, 0.0 }
  0xba   :  { %v278_v31 = vmax.f32 %v276_v29, 0.0  ;;  %521 = vmatpush.bf16.msrb.mxu0 %v830_v60 }
  0xbb   :  { %v281_v32 = vadd.f32 1e-05, %v277_v30 }
  0xbc   :  { %v282_v33 = vadd.f32 1e-05, %v278_v31 }
  0xbd   :  { %866 = vrsqrt.f32 %v281_v32  ;;  %vm289_vm6 = vweird.f32 %v281_v32 }
  0xbe   :  { %868 = vrsqrt.f32 %v282_v33  ;;  %vm299_vm8 = vweird.f32 %v282_v33  ;;  %522 = vmatpush.bf16.msrb.mxu0 %v829_v50 }
  0xc2   :  { %523 = vmatpush.bf16.msrb.mxu0 %v828_v2 }
  0xc3   :  { %v867_v34 = vpop.eup %866 }
  0xc4   :  { %v869_v35 = vpop.eup %868  ;;  %v284_v36 = vmul.f32 %v867_v34, %v281_v32  ;;  %vm290_vm4 = vweird.f32 %v867_v34 }
  0xc5   :  { %v294_v37 = vmul.f32 %v869_v35, %v282_v33  ;;  %vm300_vm5 = vweird.f32 %v869_v35  ;;  %vm291_vm7 = vmor %vm289_vm6, %vm290_vm4 }
  0xc6   :  { %v285_v38 = vmul.f32 %v867_v34, %v284_v36  ;;  %vm301_vm9 = vmor %vm299_vm8, %vm300_vm5  ;;  %524 = vmatpush.bf16.msrb.mxu0 %v827_v7 }
  0xc7   :  { %v295_v39 = vmul.f32 %v869_v35, %v294_v37 }
  0xc8   :  { %v286_v40 = vmul.f32 0.5, %v285_v38  ;;  %v841_v38 = vld [vmem:[#allocation8 + $0xf8] sm:$0xff] }
  0xc9   :  { %v296_v41 = vmul.f32 0.5, %v295_v39  ;;  %615 = vmatpush.bf16.msrb.mxu1 %v841_v38  ;;  %v840_v39 = vld [vmem:[#allocation8 + $0xf0] sm:$0xff] }
  0xca   :  { %v287_v42 = vsub.f32 1.5, %v286_v40  ;;  %525 = vmatpush.bf16.msrb.mxu0 %v826_v15  ;;  %v839_v40 = vld [vmem:[#allocation8 + $0xe8] sm:$0xff] }
  0xcb   :  { %v297_v43 = vsub.f32 1.5, %v296_v41  ;;  %v838_v41 = vld [vmem:[#allocation8 + $0xe0] sm:$0xff] }
  0xcc   :  { %v288_v44 = vmul.f32 %v867_v34, %v287_v42  ;;  %v862_v42 = vld [vmem:[#allocation9 + $0x3] ss:$0 sm:$0xff] }
  0xcd   :  { %v298_v46 = vmul.f32 %v869_v35, %v297_v43  ;;  %616 = vmatpush.bf16.msrb.mxu1 %v840_v39  ;;  %v837_v43 = vld [vmem:[#allocation8 + $0xd8] sm:$0xff] }
  0xce   :  { %v292_v47 = vsel %vm291_vm7, %v867_v34, %v288_v44 }
  0xcf   :  { %v303_v51 = vmul.f32 %v292_v47, %v279_v45  ;;  %v302_v52 = vsel %vm301_vm9, %v869_v35, %v298_v46  ;;  %v836_v46 = vld [vmem:[#allocation8 + $0xd0] sm:$0xff] }
  0xd0   :  { %v304_v53 = vmul.f32 %v302_v52, %v280_v49 }
  0xd1   :  { %v305_v54 = vmax.f32 %v303_v51, 0.0  ;;  %617 = vmatpush.bf16.msrb.mxu1 %v839_v40 }
  0xd2   :  { %v306_v55 = vmax.f32 %v304_v53, 0.0  ;;  %v835_v53 = vld [vmem:[#allocation8 + $0xc8] sm:$0xff] }
  0xd3   :  { %v307_v56 = vpack.c.bf16 %v305_v54, %v305_v54 }
  0xd4   :  { %v308_v57 = vpack.c.bf16 %v306_v55, %v306_v55 }
  0xd5   :  { %416 = vmatmul.bf16.vlgmr.msra.gmra.mxu2 %v307_v56  ;;  %618 = vmatpush.bf16.msrb.mxu1 %v838_v41 }
  0xd6   :  { %429 = vmatmul.bf16.vlgmr.msra.gmra.mxu3 %v308_v57 }
  0xd9   :  { %619 = vmatpush.bf16.msrb.mxu1 %v837_v43 }
  0xdd   :  { %620 = vmatpush.bf16.msrb.mxu1 %v836_v46 }
  0xe1   :  { %621 = vmatpush.bf16.msrb.mxu1 %v835_v53 }
  0xe5   :  { %622 = vmatpush.bf16.msrb.mxu1 %v834_v59 }
 0x158   :  { %v417_v62 = vpop.f32.mrf.mxu2 }
 0x159   :  { %v418_v63 = vadd.f32 %v861_v61, %v417_v62  ;;  %v430_v0 = vpop.f32.mrf.mxu3 }
 0x15b   :  { %v431_v1 = vadd.f32 %v430_v0, %v418_v63 }
 0x15d   :  { %v434_v3 = vrot.slane %v431_v1, 4  ;;  %v441_v4 = vmul.f32 %v431_v1, %v431_v1 }
 0x15f   :  { %v435_v5 = vadd.f32 %v434_v3, %v431_v1  ;;  %v442_v6 = vrot.slane %v441_v4, 4 }
 0x160   :  { %v419_v8 = vpop.f32.mrf.mxu2 }
 0x161   :  { %v436_v9 = vrot.slane %v435_v5, 2  ;;  %v443_v10 = vadd.f32 %v442_v6, %v441_v4  ;;  %v432_v11 = vpop.f32.mrf.mxu3 }
 0x163   :  { %v437_v12 = vadd.f32 %v436_v9, %v435_v5  ;;  %v444_v13 = vrot.slane %v443_v10, 2 }
 0x165   :  { %v438_v16 = vrot.slane %v437_v12, 1  ;;  %v445_v17 = vadd.f32 %v444_v13, %v443_v10 }
 0x167   :  { %v446_v18 = vrot.slane %v445_v17, 1  ;;  %v439_v19 = vadd.f32 %v438_v16, %v437_v12 }
 0x169   :  { %v447_v20 = vadd.f32 %v446_v18, %v445_v17  ;;  %v440_v21 = vmul.f32 %v439_v19, %v1062_v14 }
 0x16b   :  { %v448_v22 = vmul.f32 %v447_v20, %v1062_v14  ;;  %v449_v23 = vmul.f32 %v440_v21, %v440_v21  ;;  %v452_v33 = vsub.f32 %v431_v1, %v440_v21 }
 0x16d   :  { %v450_v24 = vsub.f32 %v448_v22, %v449_v23 }
 0x16f   :  { %v451_v25 = vmax.f32 %v450_v24, 0.0 }
 0x171   :  { %v453_v26 = vadd.f32 1e-05, %v451_v25 }
 0x173   :  { %870 = vrsqrt.f32 %v453_v26  ;;  %vm460_vm11 = vweird.f32 %v453_v26 }
 0x179   :  { %v871_v27 = vpop.eup %870 }
 0x17a   :  { %v455_v28 = vmul.f32 %v871_v27, %v453_v26  ;;  %vm461_vm10 = vweird.f32 %v871_v27 }
 0x17b   :  { %vm462_vm12 = vmor %vm460_vm11, %vm461_vm10 }
 0x17c   :  { %v456_v29 = vmul.f32 %v871_v27, %v455_v28 }
 0x17e   :  { %v457_v30 = vmul.f32 0.5, %v456_v29 }
 0x180   :  { %v458_v31 = vsub.f32 1.5, %v457_v30 }
 0x182   :  { %v459_v32 = vmul.f32 %v871_v27, %v458_v31 }
 0x184   :  { %v463_v34 = vsel %vm462_vm12, %v871_v27, %v459_v32 }
 0x185   :  { %v464_v35 = vmul.f32 %v463_v34, %v452_v33 }
 0x187   :  { %v465_v36 = vmax.f32 %v464_v35, 0.0 }
 0x189   :  { %v466_v37 = vpack.c.bf16 %v465_v36, %v465_v36 }
 0x18b   :  { %526 = vmatmul.bf16.vlgmr.msrb.gmra.mxu0 %v466_v37 }
 0x208   :  { %v527_v44 = vpop.f32.mrf.mxu0 }
 0x209   :  { %v528_v45 = vadd.f32 %v862_v42, %v527_v44 }
 0x20b   :  { %v531_v47 = vrot.slane %v528_v45, 4  ;;  %v538_v49 = vmul.f32 %v528_v45, %v528_v45 }
 0x20d   :  { %v532_v51 = vadd.f32 %v531_v47, %v528_v45  ;;  %v539_v52 = vrot.slane %v538_v49, 4 }
 0x20f   :  { %v533_v54 = vrot.slane %v532_v51, 2  ;;  %v540_v55 = vadd.f32 %v539_v52, %v538_v49 }
 0x210   :  { %v529_v56 = vpop.f32.mrf.mxu0 }
 0x211   :  { %v534_v57 = vadd.f32 %v533_v54, %v532_v51  ;;  %v541_v58 = vrot.slane %v540_v55, 2 }
 0x213   :  { %v535_v48 = vrot.slane %v534_v57, 1  ;;  %v542_v60 = vadd.f32 %v541_v58, %v540_v55 }
 0x215   :  { %v543_v61 = vrot.slane %v542_v60, 1  ;;  %v536_v50 = vadd.f32 %v535_v48, %v534_v57 }
 0x217   :  { %v544_v62 = vadd.f32 %v543_v61, %v542_v60  ;;  %v537_v63 = vmul.f32 %v536_v50, %v1062_v14 }
 0x219   :  { %v545_v0 = vmul.f32 %v544_v62, %v1062_v14  ;;  %v546_v1 = vmul.f32 %v537_v63, %v537_v63  ;;  %v549_v11 = vsub.f32 %v528_v45, %v537_v63  ;;  %v863_v14 = vld [vmem:[#allocation9 + $0x4] ss:$0 sm:$0xff] }
 0x21b   :  { %v547_v2 = vsub.f32 %v545_v0, %v546_v1 }
 0x21d   :  { %v548_v3 = vmax.f32 %v547_v2, 0.0 }
 0x21f   :  { %v550_v4 = vadd.f32 1e-05, %v548_v3 }
 0x221   :  { %872 = vrsqrt.f32 %v550_v4  ;;  %vm557_vm14 = vweird.f32 %v550_v4 }
 0x227   :  { %v873_v5 = vpop.eup %872 }
 0x228   :  { %v552_v6 = vmul.f32 %v873_v5, %v550_v4  ;;  %vm558_vm13 = vweird.f32 %v873_v5 }
 0x229   :  { %vm559_vm15 = vmor %vm557_vm14, %vm558_vm13 }
 0x22a   :  { %v553_v7 = vmul.f32 %v873_v5, %v552_v6 }
 0x22c   :  { %v554_v8 = vmul.f32 0.5, %v553_v7 }
 0x22e   :  { %v555_v9 = vsub.f32 1.5, %v554_v8 }
 0x230   :  { %v556_v10 = vmul.f32 %v873_v5, %v555_v9 }
 0x232   :  { %v560_v12 = vsel %vm559_vm15, %v873_v5, %v556_v10 }
 0x233   :  { %v561_v13 = vmul.f32 %v560_v12, %v549_v11 }
 0x235   :  { %v562_v15 = vmax.f32 %v561_v13, 0.0 }
 0x237   :  { %v563_v16 = vpack.c.bf16 %v562_v15, %v562_v15 }
 0x239   :  { %623 = vmatmul.bf16.vlgmr.msrb.gmra.mxu1 %v563_v16 }
 0x2b6   :  { %v624_v17 = vpop.f32.mrf.mxu1 }
 0x2b7   :  { %v625_v18 = vadd.f32 %v863_v14, %v624_v17 }
 0x2b9   :  { %628 = vst [vmem:[#allocation11] sm:$0xff] %v625_v18 }
 0x2ba   :  { %639 = dma.vmem_to_hbm [thread:$0]  %s635_s3, 128, %s637_s13, [#allocation5]  }
 0x2be   :  { %v626_v19 = vpop.f32.mrf.mxu1 }
 0x2bf   :  { %1000 = dma.done.wait [#allocation5], 128  }
 0x2c0   :  { %1001 = vsyncadd [#allocation5], 4294967168 }
 0x2c1   :  { %644 = vsyncpa [#allocation4], 1 }
 0x2c2   :  { %645 = vsyncpa [#allocation7], 1 }
 0x2c3   :  { %646 = vsyncpa [#allocation10], 1 }
 0x2c4   :  { %647 = vsyncpa [#allocation5], 1 }

</bundles_post_ra>
